<compile_context>
chip_gen: v6e
topology: v6e:2x2x1
jax: 0.10.0
libtpu: 0.0.40
codegen_flags: <defaults>
</compile_context>

<pallas_src>
import functools

import jax
import jax.numpy as jnp
from jax.experimental import pallas as pl
from jax.experimental.pallas import tpu as pltpu

IN_DIM = 25          # raw input features (the module hard-codes Linear(25, fc1))
IN_PAD = 32          # lightly padded input feature dim (zero padding)
FC1 = 256
FC2 = 256
A_PAD = 128          # lane-padded action dim (unmasked, lane-dense stores)
NEG_BIAS = -1e30     # bias for padded logits -> exp underflows to exactly 0
MAX_BLOCK_B = 1024   # above this many rows, tile the batch (grid > 1 step)


def _round_up(n, m):
    return ((n + m - 1) // m) * m


def actor_kernel(x_ref, w1_ref, b1_ref, w2_ref, b2_ref, w3_ref, b3_ref, out_ref):
    # Matmul operands in bf16 (MXU native), accumulation + elementwise math
    # (bias add, ReLU, softmax) in f32.
    x = x_ref[...].astype(jnp.bfloat16)

    h1 = jnp.dot(x, w1_ref[...], preferred_element_type=jnp.float32) + b1_ref[...]
    h1 = jnp.maximum(h1, 0.0).astype(jnp.bfloat16)

    h2 = jnp.dot(h1, w2_ref[...], preferred_element_type=jnp.float32) + b2_ref[...]
    h2 = jnp.maximum(h2, 0.0).astype(jnp.bfloat16)

    logits = jnp.dot(h2, w3_ref[...], preferred_element_type=jnp.float32) + b3_ref[...]

    # Numerically-stable softmax over the lane-dense (padded) action axis.
    # Padded lanes carry a -1e30 bias: they never win the max and exp -> 0.
    m = jnp.max(logits, axis=-1, keepdims=True)
    e = jnp.exp(logits - m)
    s = jnp.sum(e, axis=-1, keepdims=True)
    out_ref[...] = (e / s).astype(out_ref.dtype)   # exact division (see review)


def prepare_actor_params(w1, b1, w2, b2, w3, b3):
    """One-time parameter prep (pad + bf16 cast), hoisted out of the hot path."""
    in_dim, fc1 = w1.shape
    assert in_dim == IN_DIM and fc1 == FC1 and w2.shape == (FC1, FC2)
    A = w3.shape[1]
    assert A <= A_PAD

    w1_p = jnp.pad(w1.astype(jnp.float32),
                   ((0, IN_PAD - in_dim), (0, 0))).astype(jnp.bfloat16)
    w2_p = w2.astype(jnp.bfloat16)
    w3_p = jnp.pad(w3.astype(jnp.float32),
                   ((0, 0), (0, A_PAD - A))).astype(jnp.bfloat16)
    b1_p = jnp.asarray(b1, jnp.float32).reshape(1, FC1)
    b2_p = jnp.asarray(b2, jnp.float32).reshape(1, FC2)
    b3_p = jnp.pad(jnp.asarray(b3, jnp.float32).reshape(1, A),
                   ((0, 0), (0, A_PAD - A)), constant_values=NEG_BIAS)
    return (w1_p, b1_p, w2_p, b2_p, w3_p, b3_p)


@functools.partial(jax.jit, static_argnames=("n_actions", "block_b"))
def actor_forward(x, params, *, n_actions, block_b=None):
    """Returns Softmax(fc3(ReLU(fc2(ReLU(fc1(x)))))) of shape [B, n_actions]."""
    w1_p, b1_p, w2_p, b2_p, w3_p, b3_p = params
    B, in_dim = x.shape
    assert in_dim == IN_DIM
    assert n_actions <= A_PAD

    # Single grid step for small/medium batches (single-TC v5e/v6e: grid == serial
    # loop, per-step overhead dominates).  Large batches tile at MAX_BLOCK_B rows;
    # the resulting multi-step grid is "parallel" so v7x can shard it across TCs.
    if block_b is None:
        block_b = min(max(_round_up(B, 8), 8), MAX_BLOCK_B)
    assert block_b % 8 == 0

    B_pad = pl.cdiv(B, block_b) * block_b
    # Only x is touched per call: pad batch + feature dims (zero padding is
    # numerically inert), keep f32 and cast to bf16 inside the kernel.
    x_p = jnp.pad(x.astype(jnp.float32), ((0, B_pad - B), (0, IN_PAD - in_dim)))

    grid = (B_pad // block_b,)

    out = pl.pallas_call(
        actor_kernel,
        out_shape=jax.ShapeDtypeStruct((B_pad, A_PAD), jnp.float32),
        grid_spec=pltpu.PrefetchScalarGridSpec(
            num_scalar_prefetch=0,
            grid=grid,
            in_specs=[
                pl.BlockSpec((block_b, IN_PAD), lambda i: (i, 0)),  # x batch tile
                pl.BlockSpec((IN_PAD, FC1), lambda i: (0, 0)),      # w1 (resident)
                pl.BlockSpec((1, FC1), lambda i: (0, 0)),           # b1
                pl.BlockSpec((FC1, FC2), lambda i: (0, 0)),         # w2
                pl.BlockSpec((1, FC2), lambda i: (0, 0)),           # b2
                pl.BlockSpec((FC2, A_PAD), lambda i: (0, 0)),       # w3 (padded)
                pl.BlockSpec((1, A_PAD), lambda i: (0, 0)),         # b3 (padded)
            ],
            out_specs=pl.BlockSpec((block_b, A_PAD), lambda i: (i, 0)),
        ),
        compiler_params=pltpu.CompilerParams(
            dimension_semantics=("parallel",)),
    )(x_p, w1_p, b1_p, w2_p, b2_p, w3_p, b3_p)

    return out[:B, :n_actions]


def init_linear(key, fan_in, fan_out):
    """Deterministic init mimicking PyTorch nn.Linear default U(-1/sqrt(fan_in), +)."""
    kw, kb = jax.random.split(key)
    bound = 1.0 / jnp.sqrt(jnp.float32(fan_in))
    # stored as [in, out] so the kernel computes x @ W (== x @ W_pt.T)
    w = jax.random.uniform(kw, (fan_in, fan_out), jnp.float32, -bound, bound)
    b = jax.random.uniform(kb, (1, fan_out), jnp.float32, -bound, bound)
    return w, b


def reference_forward_f32(x, w1, b1, w2, b2, w3, b3):
    h1 = jnp.maximum(x @ w1 + b1, 0.0)
    h2 = jnp.maximum(h1 @ w2 + b2, 0.0)
    logits = h2 @ w3 + b3
    return jax.nn.softmax(logits, axis=-1)


def reference_forward_bf16(x, w1, b1, w2, b2, w3, b3):
    # Matches the kernel's numerics (bf16 operands, f32 accumulation) so that
    # real kernel regressions aren't hidden behind a loose bf16 tolerance.
    def mm(a, w):
        return jnp.dot(a.astype(jnp.bfloat16), w.astype(jnp.bfloat16),
                       preferred_element_type=jnp.float32)
    h1 = jnp.maximum(mm(x, w1) + b1, 0.0)
    h2 = jnp.maximum(mm(h1, w2) + b2, 0.0)
    logits = mm(h2, w3) + b3
    return jax.nn.softmax(logits, axis=-1)


if __name__ == "__main__":
    n_actions = 4
    batch = 13   # small, not a multiple of 8 -> exercises batch padding

    key = jax.random.PRNGKey(0)
    k_x, k1, k2, k3 = jax.random.split(key, 4)

    x = jax.random.normal(k_x, (batch, IN_DIM), jnp.float32)
    w1, b1 = init_linear(k1, IN_DIM, FC1)
    w2, b2 = init_linear(k2, FC1, FC2)
    w3, b3 = init_linear(k3, FC2, n_actions)

    # One-time parameter prep (hot path only pads/casts x).
    params = jax.block_until_ready(prepare_actor_params(w1, b1, w2, b2, w3, b3))

    probs = actor_forward(x, params, n_actions=n_actions)
    probs = jax.block_until_ready(probs)

    ref_f32 = reference_forward_f32(x, w1, b1, w2, b2, w3, b3)
    ref_bf16 = reference_forward_bf16(x, w1, b1, w2, b2, w3, b3)

    assert probs.shape == (batch, n_actions)
    assert bool(jnp.all(probs >= 0.0))
    # exact division -> row sums are 1 to f32 precision
    assert jnp.allclose(jnp.sum(probs, axis=-1), 1.0, atol=1e-5)
    # tight check against the bf16-matched reference (isolates kernel bugs)
    assert jnp.allclose(probs, ref_bf16, atol=2e-3)
    # loose check against the pure-f32 PyTorch-equivalent reference
    assert jnp.allclose(probs, ref_f32, atol=1e-2)

    # TODO(synk): Categorical(probs) itself (sampling / log_prob bookkeeping) is
    # host-side distribution logic, not kernel compute; the kernel returns `probs`.
    print("KERNEL_OK")
</pallas_src>

<mosaic_0001>
module attributes {stable_mosaic.version = 11 : i64} {
  func.func @actor_kernel(%arg0: i32, %arg1: memref<16x32xf32, #tpu.memory_space<vmem>>, %arg2: memref<32x256xbf16, #tpu.memory_space<vmem>>, %arg3: memref<1x256xf32, #tpu.memory_space<vmem>>, %arg4: memref<256x256xbf16, #tpu.memory_space<vmem>>, %arg5: memref<1x256xf32, #tpu.memory_space<vmem>>, %arg6: memref<256x128xbf16, #tpu.memory_space<vmem>>, %arg7: memref<1x128xf32, #tpu.memory_space<vmem>>, %arg8: memref<16x128xf32, #tpu.memory_space<vmem>>) attributes {dimension_semantics = [#tpu.dimension_semantics<parallel>], iteration_bounds = array<i64: 1>, scalar_prefetch = 0 : i64, scratch_operands = 0 : i64, tpu.core_type = #tpu.core_type<tc>, window_params = [{transform_indices = @transform_0, window_bounds = array<i64: 16, 32>}, {pipeline_mode = #tpu.pipeline_mode<synchronous>, transform_indices = @transform_1, window_bounds = array<i64: 32, 256>}, {pipeline_mode = #tpu.pipeline_mode<synchronous>, transform_indices = @transform_2, window_bounds = array<i64: 1, 256>}, {pipeline_mode = #tpu.pipeline_mode<synchronous>, transform_indices = @transform_3, window_bounds = array<i64: 256, 256>}, {pipeline_mode = #tpu.pipeline_mode<synchronous>, transform_indices = @transform_4, window_bounds = array<i64: 1, 256>}, {pipeline_mode = #tpu.pipeline_mode<synchronous>, transform_indices = @transform_5, window_bounds = array<i64: 256, 128>}, {pipeline_mode = #tpu.pipeline_mode<synchronous>, transform_indices = @transform_6, window_bounds = array<i64: 1, 128>}, {transform_indices = @transform_7, window_bounds = array<i64: 16, 128>}]} {
    %c0 = arith.constant 0 : index
    %c0_0 = arith.constant 0 : index
    %0 = vector.load %arg1[%c0, %c0_0] : memref<16x32xf32, #tpu.memory_space<vmem>>, vector<16x32xf32>
    %1 = arith.truncf %0 : vector<16x32xf32> to vector<16x32xbf16>
    %c0_1 = arith.constant 0 : index
    %c0_2 = arith.constant 0 : index
    %2 = vector.load %arg2[%c0_1, %c0_2] : memref<32x256xbf16, #tpu.memory_space<vmem>>, vector<32x256xbf16>
    %cst = arith.constant dense<0.000000e+00> : vector<16x256xf32>
    %3 = tpu.matmul %1, %2, %cst {dimension_numbers = #tpu.dot_dimension_numbers<[1], [0], [0], [1], [0, 0, 1, 1], [], []>} : vector<16x32xbf16>, vector<32x256xbf16>, vector<16x256xf32> -> vector<16x256xf32>
    %c0_3 = arith.constant 0 : index
    %c0_4 = arith.constant 0 : index
    %4 = vector.load %arg3[%c0_3, %c0_4] : memref<1x256xf32, #tpu.memory_space<vmem>>, vector<1x256xf32>
    %5 = vector.broadcast %4 : vector<1x256xf32> to vector<16x256xf32>
    %6 = arith.addf %3, %5 : vector<16x256xf32>
    %cst_5 = arith.constant 0.000000e+00 : f32
    %7 = vector.broadcast %cst_5 : f32 to vector<16x256xf32>
    %8 = arith.maximumf %6, %7 : vector<16x256xf32>
    %9 = arith.truncf %8 : vector<16x256xf32> to vector<16x256xbf16>
    %c0_6 = arith.constant 0 : index
    %c0_7 = arith.constant 0 : index
    %10 = vector.load %arg4[%c0_6, %c0_7] : memref<256x256xbf16, #tpu.memory_space<vmem>>, vector<256x256xbf16>
    %cst_8 = arith.constant dense<0.000000e+00> : vector<16x256xf32>
    %11 = tpu.matmul %9, %10, %cst_8 {dimension_numbers = #tpu.dot_dimension_numbers<[1], [0], [0], [1], [0, 0, 1, 1], [], []>} : vector<16x256xbf16>, vector<256x256xbf16>, vector<16x256xf32> -> vector<16x256xf32>
    %c0_9 = arith.constant 0 : index
    %c0_10 = arith.constant 0 : index
    %12 = vector.load %arg5[%c0_9, %c0_10] : memref<1x256xf32, #tpu.memory_space<vmem>>, vector<1x256xf32>
    %13 = vector.broadcast %12 : vector<1x256xf32> to vector<16x256xf32>
    %14 = arith.addf %11, %13 : vector<16x256xf32>
    %cst_11 = arith.constant 0.000000e+00 : f32
    %15 = vector.broadcast %cst_11 : f32 to vector<16x256xf32>
    %16 = arith.maximumf %14, %15 : vector<16x256xf32>
    %17 = arith.truncf %16 : vector<16x256xf32> to vector<16x256xbf16>
    %c0_12 = arith.constant 0 : index
    %c0_13 = arith.constant 0 : index
    %18 = vector.load %arg6[%c0_12, %c0_13] : memref<256x128xbf16, #tpu.memory_space<vmem>>, vector<256x128xbf16>
    %cst_14 = arith.constant dense<0.000000e+00> : vector<16x128xf32>
    %19 = tpu.matmul %17, %18, %cst_14 {dimension_numbers = #tpu.dot_dimension_numbers<[1], [0], [0], [1], [0, 0, 1, 1], [], []>} : vector<16x256xbf16>, vector<256x128xbf16>, vector<16x128xf32> -> vector<16x128xf32>
    %c0_15 = arith.constant 0 : index
    %c0_16 = arith.constant 0 : index
    %20 = vector.load %arg7[%c0_15, %c0_16] : memref<1x128xf32, #tpu.memory_space<vmem>>, vector<1x128xf32>
    %21 = vector.broadcast %20 : vector<1x128xf32> to vector<16x128xf32>
    %22 = arith.addf %19, %21 : vector<16x128xf32>
    %cst_17 = arith.constant dense<0xFF800000> : vector<16xf32>
    %23 = vector.multi_reduction <maximumf>, %22, %cst_17 [1] : vector<16x128xf32> to vector<16xf32>
    %24 = vector.shape_cast %23 : vector<16xf32> to vector<16x1xf32>
    %25 = vector.broadcast %24 : vector<16x1xf32> to vector<16x128xf32>
    %26 = arith.subf %22, %25 : vector<16x128xf32>
    %27 = math.exp %26 : vector<16x128xf32>
    %cst_18 = arith.constant dense<0.000000e+00> : vector<16xf32>
    %28 = vector.multi_reduction <add>, %27, %cst_18 [1] : vector<16x128xf32> to vector<16xf32>
    %29 = vector.shape_cast %28 : vector<16xf32> to vector<16x1xf32>
    %30 = vector.broadcast %29 : vector<16x1xf32> to vector<16x128xf32>
    %31 = arith.divf %27, %30 : vector<16x128xf32>
    %c0_19 = arith.constant 0 : index
    %c0_20 = arith.constant 0 : index
    %32 = vector.load %arg8[%c0_19, %c0_20] : memref<16x128xf32, #tpu.memory_space<vmem>>, vector<16x128xf32>
    tpu.vector_store %arg8[%c0_19, %c0_20], %31 {strides = array<i32>} : memref<16x128xf32, #tpu.memory_space<vmem>>, vector<16x128xf32>,
    return
  }
  func.func @transform_0(%arg0: i32) -> (i32, i32) {
    %c0_i32 = arith.constant 0 : i32
    %c0_i32_0 = arith.constant 0 : i32
    return %arg0, %c0_i32 : i32, i32
  }
  func.func @transform_1(%arg0: i32) -> (i32, i32) {
    %c0_i32 = arith.constant 0 : i32
    %c0_i32_0 = arith.constant 0 : i32
    %c0_i32_1 = arith.constant 0 : i32
    return %c0_i32, %c0_i32_0 : i32, i32
  }
  func.func @transform_2(%arg0: i32) -> (i32, i32) {
    %c0_i32 = arith.constant 0 : i32
    %c0_i32_0 = arith.constant 0 : i32
    %c0_i32_1 = arith.constant 0 : i32
    return %c0_i32, %c0_i32_0 : i32, i32
  }
  func.func @transform_3(%arg0: i32) -> (i32, i32) {
    %c0_i32 = arith.constant 0 : i32
    %c0_i32_0 = arith.constant 0 : i32
    %c0_i32_1 = arith.constant 0 : i32
    return %c0_i32, %c0_i32_0 : i32, i32
  }
  func.func @transform_4(%arg0: i32) -> (i32, i32) {
    %c0_i32 = arith.constant 0 : i32
    %c0_i32_0 = arith.constant 0 : i32
    %c0_i32_1 = arith.constant 0 : i32
    return %c0_i32, %c0_i32_0 : i32, i32
  }
  func.func @transform_5(%arg0: i32) -> (i32, i32) {
    %c0_i32 = arith.constant 0 : i32
    %c0_i32_0 = arith.constant 0 : i32
    %c0_i32_1 = arith.constant 0 : i32
    return %c0_i32, %c0_i32_0 : i32, i32
  }
  func.func @transform_6(%arg0: i32) -> (i32, i32) {
    %c0_i32 = arith.constant 0 : i32
    %c0_i32_0 = arith.constant 0 : i32
    %c0_i32_1 = arith.constant 0 : i32
    return %c0_i32, %c0_i32_0 : i32, i32
  }
  func.func @transform_7(%arg0: i32) -> (i32, i32) {
    %c0_i32 = arith.constant 0 : i32
    %c0_i32_0 = arith.constant 0 : i32
    return %arg0, %c0_i32 : i32, i32
  }
}

</mosaic_0001>

<bundles_post_ra>
// kernel: actor_forward.1
= control target key start
LH: loop header
LB: loop body
LE: loop exit
PB: predicated region body
PF: predicated region fallthrough
CT: control target
= control target key end

     0   :  { %12 = vsyncpa [#allocation3], 0  ;;  %s893_s0 = inlined_call_operand.vmem [shape: f32[16,32], index: 0, kind: input, shape index: {}]   ;;  %s894_s1 = inlined_call_operand.vmem [shape: bf16[32,256], index: 1, kind: input, shape index: {}]   ;;  %s895_s2 = inlined_call_operand.vmem [shape: f32[1,256], index: 2, kind: input, shape index: {}]   ;;  %s896_s3 = inlined_call_operand.hbm [shape: bf16[256,256], index: 3, kind: input, shape index: {}]   ;;  %s897_s4 = inlined_call_operand.vmem [shape: f32[1,256], index: 4, kind: input, shape index: {}]   ;;  %s898_s5 = inlined_call_operand.hbm [shape: bf16[256,128], index: 5, kind: input, shape index: {}]   ;;  %s899_s6 = inlined_call_operand.vmem [shape: f32[1,128], index: 6, kind: input, shape index: {}]   ;;  %s900_s7 = inlined_call_operand.vmem [shape: f32[16,128], index: 7, kind: output, shape index: {}]  }
   0x1   :  { %13 = vsyncpa [#allocation5], 0  ;;  %s807_s24 = smov [#allocation2]  }
   0x2   :  { %s25_s25 = sshll.u32 %s807_s24, 4  ;;  %s26_s25 = int_to_ptr.vmem [resolvable:$true] %s25_s25 }
   0x3   :  { %s771_s26 = scalar_lea.vmem %s26_s25, 4096  ;;  %p776_p1 = scmp.lt.s32.totalorder %s26_s25, %s26_s25 }
   0x4   :  { %p772_p0 = scmp.ne.s32.totalorder %s26_s25, %s771_s26  ;;  %p777_p2 = scmp.lt.s32.totalorder %s771_s26, %s771_s26 }
   0x6   :  { %p778_p3 = por %p777_p2, %p776_p1 }
   0x8   :  { %p779_p4 = pnand %p778_p3, %p772_p0 }
   0xa   :  { %782 = shalt.err (!%p779_p4)
}
   0xb   :  { %s808_s27 = smov 128   ;;  %s809_s28 = smov 8  }
   0xc   :  { %31 = dma.hbm_to_vmem [thread:$0]  %s896_s3, 4096, %s26_s25, [#allocation3], %s808_s27, %s808_s27, %s809_s28  }
   0xd   :  { %s810_s8 = smov [#allocation4]  }
   0xe   :  { %s39_s9 = sshll.u32 %s810_s8, 4  ;;  %s40_s9 = int_to_ptr.vmem [resolvable:$true] %s39_s9 }
   0xf   :  { %s791_s10 = scalar_lea.vmem %s40_s9, 2048  ;;  %p796_p6 = scmp.lt.s32.totalorder %s40_s9, %s40_s9 }
  0x10   :  { %p792_p5 = scmp.ne.s32.totalorder %s40_s9, %s791_s10  ;;  %p797_p7 = scmp.lt.s32.totalorder %s791_s10, %s791_s10 }
  0x12   :  { %p798_p8 = por %p797_p7, %p796_p6 }
  0x14   :  { %p799_p9 = pnand %p798_p8, %p792_p5 }
  0x16   :  { %802 = shalt.err (!%p799_p9)
}
  0x17   :  { %s811_s11 = smov 64   ;;  %s812_s12 = smov 4  }
  0x18   :  { %45 = dma.hbm_to_vmem [thread:$0]  %s898_s5, 2048, %s40_s9, [#allocation5], %s811_s11, %s811_s11, %s812_s12  }
  0x19   :  { %803 = dma.done.wait [#allocation3], 4096  }
  0x1a   :  { %804 = vsyncadd [#allocation3], 4294963200 }
  0x1b   :  { %805 = dma.done.wait [#allocation5], 2048  }
  0x1c   :  { %806 = vsyncadd [#allocation5], 4294965248  ;;  %v813_v0 = vmov 0   ;;  %v685_v1 = vld [vmem:[%s894_s1 + $0x14] ss:$8 sps:$4 sm:$0xff]   ;;  %v55_v5 = vld [vmem:[%s893_s0] sm:$0xff]  ;;  %v64_v50 = vlaneseq }
  0x1d   :  { %130 = vmatprep.mubr.bf16.mxu0 %v813_v0  ;;  %v687_v2 = vld [vmem:[%s894_s1 + $0x10] ss:$8 sps:$4 sm:$0xff]   ;;  %110 = vmatprep.subr.bf16.mxu0 %v685_v1  ;;  %v688_v3 = vld [vmem:[%s894_s1 + $0x4] ss:$8 sps:$4 sm:$0xff]   ;;  %v690_v4 = vld [vmem:[%s894_s1] ss:$8 sps:$4 sm:$0xff]  }
  0x1e   :  { %111 = vmatpush1.bf16.msra.mxu0 %v687_v2  ;;  %v56_v6 = vld [vmem:[%s893_s0 + $0x8] sm:$0xff]  ;;  %v691_v7 = vld [vmem:[#allocation2 + $0x74] ss:$8 sps:$4 sm:$0xff]   ;;  %v693_v8 = vld [vmem:[#allocation2 + $0x70] ss:$8 sps:$4 sm:$0xff]   ;;  %vm94_vm0 = vcmask 261120  }
  0x1f   :  { %112 = vmatprep.subr.bf16.mxu0 %v688_v3  ;;  %v694_v9 = vld [vmem:[#allocation2 + $0x64] ss:$8 sps:$4 sm:$0xff]   ;;  %v57_v10 = vpack.c.bf16 %v56_v6, %v55_v5  ;;  %351 = vmatprep.subr.bf16.mxu1 %v691_v7  ;;  %v696_v11 = vld [vmem:[#allocation2 + $0x60] ss:$8 sps:$4 sm:$0xff]   ;;  %v697_v12 = vld [vmem:[#allocation2 + $0x54] ss:$8 sps:$4 sm:$0xff]  }
  0x20   :  { %352 = vmatpush1.bf16.msra.mxu1 %v693_v8  ;;  %v699_v13 = vld [vmem:[#allocation2 + $0x50] ss:$8 sps:$4 sm:$0xff]   ;;  %v700_v14 = vld [vmem:[#allocation2 + $0x44] ss:$8 sps:$4 sm:$0xff]   ;;  %v702_v15 = vld [vmem:[#allocation2 + $0x40] ss:$8 sps:$4 sm:$0xff]  }
  0x21   :  { %353 = vmatprep.subr.bf16.mxu1 %v694_v9  ;;  %v703_v16 = vld [vmem:[#allocation2 + $0x34] ss:$8 sps:$4 sm:$0xff]   ;;  %v705_v17 = vld [vmem:[#allocation2 + $0x30] ss:$8 sps:$4 sm:$0xff]   ;;  %v706_v18 = vld [vmem:[#allocation2 + $0x24] ss:$8 sps:$4 sm:$0xff]  }
  0x22   :  { %113 = vmatpush1.bf16.msra.mxu0 %v690_v4  ;;  %v708_v19 = vld [vmem:[#allocation2 + $0x20] ss:$8 sps:$4 sm:$0xff]   ;;  %v709_v20 = vld [vmem:[#allocation2 + $0x14] ss:$8 sps:$4 sm:$0xff]   ;;  %v711_v21 = vld [vmem:[#allocation2 + $0x10] ss:$8 sps:$4 sm:$0xff]  }
  0x23   :  { %v712_v22 = vld [vmem:[#allocation2 + $0x4] ss:$8 sps:$4 sm:$0xff]   ;;  %v714_v23 = vld [vmem:[#allocation2] ss:$8 sps:$4 sm:$0xff]   ;;  %v715_v24 = vld [vmem:[#allocation2 + $0xf4] ss:$8 sps:$4 sm:$0xff]  }
  0x24   :  { %354 = vmatpush1.bf16.msra.mxu1 %v696_v11  ;;  %v717_v25 = vld [vmem:[#allocation2 + $0xf0] ss:$8 sps:$4 sm:$0xff]   ;;  %v718_v26 = vld [vmem:[#allocation2 + $0xe4] ss:$8 sps:$4 sm:$0xff]   ;;  %v720_v27 = vld [vmem:[#allocation2 + $0xe0] ss:$8 sps:$4 sm:$0xff]  }
  0x25   :  { %606 = vmatmul.mubr.msk.bf16.vlgmr.msra.gmra.mxu0 %vm94_vm0, %v57_v10  ;;  %355 = vmatprep.subr.bf16.mxu1 %v697_v12  ;;  %v721_v28 = vld [vmem:[#allocation2 + $0xd4] ss:$8 sps:$4 sm:$0xff]   ;;  %v723_v29 = vld [vmem:[#allocation2 + $0xd0] ss:$8 sps:$4 sm:$0xff]   ;;  %v724_v30 = vld [vmem:[#allocation2 + $0xc4] ss:$8 sps:$4 sm:$0xff]  }
  0x26   :  { %v726_v31 = vld [vmem:[#allocation2 + $0xc0] ss:$8 sps:$4 sm:$0xff]   ;;  %v727_v32 = vld [vmem:[#allocation2 + $0xb4] ss:$8 sps:$4 sm:$0xff]   ;;  %v729_v33 = vld [vmem:[#allocation2 + $0xb0] ss:$8 sps:$4 sm:$0xff]  }
  0x27   :  { %v730_v34 = vld [vmem:[#allocation2 + $0xa4] ss:$8 sps:$4 sm:$0xff]   ;;  %v732_v35 = vld [vmem:[#allocation2 + $0xa0] ss:$8 sps:$4 sm:$0xff]   ;;  %v733_v36 = vld [vmem:[#allocation2 + $0x94] ss:$8 sps:$4 sm:$0xff]  }
  0x28   :  { %356 = vmatpush1.bf16.msra.mxu1 %v699_v13  ;;  %v735_v37 = vld [vmem:[#allocation2 + $0x90] ss:$8 sps:$4 sm:$0xff]   ;;  %v736_v38 = vld [vmem:[#allocation2 + $0x84] ss:$8 sps:$4 sm:$0xff]   ;;  %v738_v39 = vld [vmem:[#allocation2 + $0x80] ss:$8 sps:$4 sm:$0xff]  }
  0x29   :  { %357 = vmatprep.subr.bf16.mxu1 %v700_v14  ;;  %v739_v40 = vld [vmem:[#allocation4 + $0x78] sm:$0xff]   ;;  %v741_v42 = vld [vmem:[#allocation4 + $0x70] sm:$0xff]   ;;  %v743_v44 = vld [vmem:[#allocation4 + $0x68] sm:$0xff]   ;;  %v65_v51 = vshrl.u32 %v64_v50, 7 }
  0x2a   :  { %v740_v41 = vld [vmem:[#allocation4 + $0x38] sm:$0xff]   ;;  %656 = vmatprep.subr.bf16.mxu0 %v739_v40  ;;  %v742_v43 = vld [vmem:[#allocation4 + $0x30] sm:$0xff]   ;;  %v744_v45 = vld [vmem:[#allocation4 + $0x28] sm:$0xff]  }
  0x2b   :  { %657 = vmatpush3.bf16.msra.mxu0 %v740_v41  ;;  %v745_v46 = vld [vmem:[#allocation4 + $0x60] sm:$0xff]   ;;  %v747_v48 = vld [vmem:[#allocation4 + $0x58] sm:$0xff]   ;;  %v70_v52 = vsub.s32 1, %v65_v51  ;;  %v66_v53 = vsub.s32 0, %v65_v51  ;;  %v749_v7 = vld [vmem:[#allocation4 + $0x50] sm:$0xff]  }
  0x2c   :  { %358 = vmatpush1.bf16.msra.mxu1 %v702_v15  ;;  %658 = vmatprep.subr.bf16.mxu0 %v741_v42  ;;  %v746_v47 = vld [vmem:[#allocation4 + $0x20] sm:$0xff]   ;;  %v748_v49 = vld [vmem:[#allocation4 + $0x18] sm:$0xff]   ;;  %v750_v8 = vld [vmem:[#allocation4 + $0x10] sm:$0xff]  }
  0x2d   :  { %359 = vmatprep.subr.bf16.mxu1 %v703_v16  ;;  %v62_v54 = vld [vmem:[%s895_s2] sm:$0x3]  ;;  %v751_v9 = vld [vmem:[#allocation4 + $0x48] sm:$0xff]  }
  0x2e   :  { %v71_v56 = vrot.slane %v62_v54, %v70_v52  ;;  %v67_v57 = vrot.slane %v62_v54, %v66_v53  ;;  %v752_v10 = vld [vmem:[#allocation4 + $0x8] sm:$0xff]   ;;  %v753_v11 = vld [vmem:[#allocation4 + $0x40] sm:$0xff]  }
  0x2f   :  { %659 = vmatpush3.bf16.msra.mxu0 %v742_v43  ;;  %v754_v12 = vld [vmem:[#allocation4] sm:$0xff]  }
  0x30   :  { %360 = vmatpush1.bf16.msra.mxu1 %v705_v17  ;;  %660 = vmatprep.subr.bf16.mxu0 %v743_v44  ;;  %v179_v13 = vld [vmem:[%s897_s4] sm:$0x3] }
  0x31   :  { %361 = vmatprep.subr.bf16.mxu1 %v706_v18  ;;  %v188_v15 = vrot.slane %v179_v13, %v70_v52  ;;  %v184_v16 = vrot.slane %v179_v13, %v66_v53 }
  0x33   :  { %661 = vmatpush3.bf16.msra.mxu0 %v744_v45 }
  0x34   :  { %362 = vmatpush1.bf16.msra.mxu1 %v708_v19  ;;  %662 = vmatprep.subr.bf16.mxu0 %v745_v46 }
  0x35   :  { %363 = vmatprep.subr.bf16.mxu1 %v709_v20 }
  0x37   :  { %663 = vmatpush3.bf16.msra.mxu0 %v746_v47 }
  0x38   :  { %364 = vmatpush1.bf16.msra.mxu1 %v711_v21  ;;  %664 = vmatprep.subr.bf16.mxu0 %v747_v48 }
  0x39   :  { %365 = vmatprep.subr.bf16.mxu1 %v712_v22 }
  0x3b   :  { %665 = vmatpush3.bf16.msra.mxu0 %v748_v49 }
  0x3c   :  { %366 = vmatpush1.bf16.msra.mxu1 %v714_v23  ;;  %666 = vmatprep.subr.bf16.mxu0 %v749_v7 }
  0x3d   :  { %367 = vmatprep.subr.bf16.mxu1 %v715_v24 }
  0x3f   :  { %667 = vmatpush3.bf16.msra.mxu0 %v750_v8 }
  0x40   :  { %368 = vmatpush2.bf16.msra.mxu1 %v717_v25  ;;  %668 = vmatprep.subr.bf16.mxu0 %v751_v9 }
  0x41   :  { %369 = vmatprep.subr.bf16.mxu1 %v718_v26 }
  0x43   :  { %669 = vmatpush3.bf16.msra.mxu0 %v752_v10 }
  0x44   :  { %370 = vmatpush2.bf16.msra.mxu1 %v720_v27  ;;  %670 = vmatprep.subr.bf16.mxu0 %v753_v11 }
  0x45   :  { %371 = vmatprep.subr.bf16.mxu1 %v721_v28 }
  0x47   :  { %671 = vmatpush3.bf16.msra.mxu0 %v754_v12 }
  0x48   :  { %372 = vmatpush2.bf16.msra.mxu1 %v723_v29 }
  0x49   :  { %373 = vmatprep.subr.bf16.mxu1 %v724_v30 }
  0x4c   :  { %374 = vmatpush2.bf16.msra.mxu1 %v726_v31 }
  0x4d   :  { %375 = vmatprep.subr.bf16.mxu1 %v727_v32  ;;  %v639_v32 = vld [vmem:[%s899_s6] ss:$0 sm:$0xff] }
  0x50   :  { %376 = vmatpush2.bf16.msra.mxu1 %v729_v33 }
  0x51   :  { %377 = vmatprep.subr.bf16.mxu1 %v730_v34 }
  0x54   :  { %378 = vmatpush2.bf16.msra.mxu1 %v732_v35 }
  0x55   :  { %379 = vmatprep.subr.bf16.mxu1 %v733_v36 }
  0x58   :  { %380 = vmatpush2.bf16.msra.mxu1 %v735_v37 }
  0x59   :  { %381 = vmatprep.subr.bf16.mxu1 %v736_v38 }
  0x5c   :  { %382 = vmatpush2.bf16.msra.mxu1 %v738_v39 }
  0xe5   :  { %v132_v55 = vpop.f32.mrf.mxu0 }
  0xe6   :  { %v133_v62 = vadd.f32 %v132_v55, %v67_v57 }
  0xe7   :  { %v134_v58 = vpop.f32.mrf.mxu0 }
  0xe8   :  { %v135_v60 = vadd.f32 %v134_v58, %v71_v56  ;;  %v141_v4 = vmax.f32 %v133_v62, 0.0 }
  0xe9   :  { %v136_v59 = vpop.f32.mrf.mxu0 }
  0xea   :  { %v137_v61 = vadd.f32 %v136_v59, %v67_v57  ;;  %v142_v2 = vmax.f32 %v135_v60, 0.0 }
  0xeb   :  { %v138_v63 = vpop.f32.mrf.mxu0 }
  0xec   :  { %v139_v0 = vadd.f32 %v138_v63, %v71_v56  ;;  %v143_v1 = vmax.f32 %v137_v61, 0.0 }
  0xee   :  { %v144_v3 = vmax.f32 %v139_v0, 0.0  ;;  %v145_v6 = vpack.c.bf16 %v143_v1, %v141_v4 }
  0xf0   :  { %v146_v5 = vpack.c.bf16 %v144_v3, %v142_v2 }
  0xf2   :  { %383 = vmatprep.mubr.bf16.mxu1 %v146_v5 }
  0xf3   :  { %384 = vmatmul.mubr.bf16.vlgmr.msra.gmra.mxu1 %v145_v6 }
 0x1b3   :  { %v385_v14 = vpop.f32.mrf.mxu1 }
 0x1b4   :  { %v386_v21 = vadd.f32 %v385_v14, %v184_v16 }
 0x1b5   :  { %v387_v17 = vpop.f32.mrf.mxu1 }
 0x1b6   :  { %v388_v19 = vadd.f32 %v387_v17, %v188_v15  ;;  %v394_v27 = vmax.f32 %v386_v21, 0.0 }
 0x1b7   :  { %v389_v18 = vpop.f32.mrf.mxu1 }
 0x1b8   :  { %v390_v20 = vadd.f32 %v389_v18, %v184_v16  ;;  %v395_v25 = vmax.f32 %v388_v19, 0.0 }
 0x1b9   :  { %v391_v22 = vpop.f32.mrf.mxu1 }
 0x1ba   :  { %v392_v23 = vadd.f32 %v391_v22, %v188_v15  ;;  %v396_v24 = vmax.f32 %v390_v20, 0.0 }
 0x1bc   :  { %v397_v26 = vmax.f32 %v392_v23, 0.0  ;;  %v398_v29 = vpack.c.bf16 %v396_v24, %v394_v27 }
 0x1be   :  { %v399_v28 = vpack.c.bf16 %v397_v26, %v395_v25 }
 0x1c0   :  { %567 = vmatprep.mubr.bf16.mxu0 %v399_v28 }
 0x1c1   :  { %568 = vmatmul.mubr.bf16.vlgmr.msra.gmra.mxu0 %v398_v29 }
 0x281   :  { %v672_v30 = vpop.f32.mrf.mxu0 }
 0x283   :  { %v673_v31 = vpop.f32.mrf.mxu0 }
 0x284   :  { %v674_v33 = vadd.f32 %v673_v31, %v672_v30 }
 0x285   :  { %v675_v34 = vpop.f32.mrf.mxu0 }
 0x286   :  { %v570_v35 = vadd.f32 %v674_v33, %v639_v32 }
 0x287   :  { %v676_v36 = vpop.f32.mrf.mxu0 }
 0x288   :  { %v677_v37 = vadd.f32 %v676_v36, %v675_v34  ;;  %576 = vmax.xlane.f32.xlu0 %v570_v35 }
 0x28a   :  { %v573_v38 = vadd.f32 %v677_v37, %v639_v32 }
 0x28c   :  { %578 = vmax.xlane.f32.xlu0 %v573_v38 }
 0x311   :  { %v577_v39 = vpop.xlane.xlu0 %576 }
 0x312   :  { %v580_v40 = vsub.f32 %v570_v35, %v577_v39 }
 0x314   :  { %v582_v41 = vmul.f32 1.442695, %v580_v40 }
 0x315   :  { %v579_v42 = vpop.xlane.xlu0 %578 }
 0x316   :  { %755 = vpow2.f32 %v582_v41  ;;  %v581_v43 = vsub.f32 %v573_v38, %v579_v42 }
 0x318   :  { %v584_v44 = vmul.f32 1.442695, %v581_v43 }
 0x31a   :  { %757 = vpow2.f32 %v584_v44 }
 0x323   :  { %v756_v45 = vpop.eup %755 }
 0x324   :  { %586 = vadd.xlane.f32.xlu1 %v756_v45 }
 0x327   :  { %v758_v46 = vpop.eup %757 }
 0x328   :  { %588 = vadd.xlane.f32.xlu1 %v758_v46 }
 0x3ad   :  { %v587_v47 = vpop.xlane.xlu1 %586 }
 0x3ae   :  { %759 = vrcp.f32 %v587_v47 }
 0x3b1   :  { %v589_v48 = vpop.xlane.xlu1 %588 }
 0x3b2   :  { %761 = vrcp.f32 %v589_v48 }
 0x3bb   :  { %v760_v49 = vpop.eup %759 }
 0x3bc   :  { %v591_v50 = vmul.f32 %v760_v49, %v756_v45 }
 0x3be   :  { %594 = vst [vmem:[%s900_s7] sm:$0xff] %v591_v50 }
 0x3bf   :  { %v762_v51 = vpop.eup %761 }
 0x3c0   :  { %v593_v52 = vmul.f32 %v762_v51, %v758_v46 }
 0x3c2   :  { %595 = vst [vmem:[%s900_s7 + $0x8] sm:$0xff] %v593_v52 }
 0x3c3   :  { %600 = vsyncpa [#allocation3], 1 }
 0x3c4   :  { %601 = vsyncpa [#allocation5], 1 }

</bundles_post_ra>
